<compile_context>
chip_gen: v7x
topology: tpu7x:2x2x1
jax: 0.10.0
libtpu: 0.0.40
codegen_flags: <defaults>
</compile_context>

<pallas_src>
import functools

import jax
import jax.numpy as jnp
from jax import lax
from jax.experimental import pallas as pl
from jax.experimental.pallas import tpu as pltpu

HIDDEN = 128       # NormLinear(source_len, 128, norm)
LN_EPS = 1e-5


def transform_embedding_kernel(
    x_ref,     # (TB, source_len)          input dtype
    w1_ref,    # (source_len, 128)         bf16
    p1_ref,    # (3, 128)   rows = [bias1, gamma1, beta1]   f32
    w2_ref,    # (128, after_pad)          bf16 (padded cols are zero)
    p2_ref,    # (3, after_pad) rows = [bias2, gamma2, beta2] f32 (padded cols zero)
    o_ref,     # (TB, after_pad)
    *,
    after_len, # true (unpadded) output feature count, for LayerNorm statistics
):
    # ---- NormLinear 1: Linear (bf16 MXU, f32 acc) -> LayerNorm -> ReLU ----
    x = x_ref[...].astype(jnp.bfloat16)
    h = jnp.dot(x, w1_ref[...], preferred_element_type=jnp.float32)
    p1 = p1_ref[...]
    h = h + p1[0:1, :]

    inv_n1 = 1.0 / HIDDEN
    mu1 = jnp.sum(h, axis=-1, keepdims=True) * inv_n1
    ms1 = jnp.sum(h * h, axis=-1, keepdims=True) * inv_n1
    var1 = jnp.maximum(ms1 - mu1 * mu1, 0.0)
    h = (h - mu1) * lax.rsqrt(var1 + LN_EPS) * p1[1:2, :] + p1[2:3, :]
    h = jnp.maximum(h, 0.0)                       # ReLU; dropout = identity (eval)

    # ---- NormLinear 2: Linear (bf16 MXU, f32 acc) -> LayerNorm -> ReLU ----
    y = jnp.dot(h.astype(jnp.bfloat16), w2_ref[...], preferred_element_type=jnp.float32)
    p2 = p2_ref[...]
    y = y + p2[0:1, :]
    # Padded lanes of y are exactly 0 (zero weight columns + zero bias), so summing over
    # all lanes but dividing by the true after_len yields the correct statistics.
    inv_n2 = 1.0 / after_len
    mu2 = jnp.sum(y, axis=-1, keepdims=True) * inv_n2
    ms2 = jnp.sum(y * y, axis=-1, keepdims=True) * inv_n2
    var2 = jnp.maximum(ms2 - mu2 * mu2, 0.0)
    y = (y - mu2) * lax.rsqrt(var2 + LN_EPS) * p2[1:2, :] + p2[2:3, :]
    y = jnp.maximum(y, 0.0)

    o_ref[...] = y.astype(o_ref.dtype)


def transform_embedding(x, params, *, tb=512):
    """x: (B, source_len).  params: dict of f32 weights.  Returns (B, after_len)."""
    B, source_len = x.shape
    after_len = params["w2"].shape[1]
    out_dtype = x.dtype

    # ---- lane-dense padding of the output feature dim (multiple of 128) ----
    after_pad = ((after_len + 127) // 128) * 128
    pad_cols = after_pad - after_len
    pad2 = lambda a: jnp.pad(a, ((0, 0), (0, pad_cols))) if pad_cols else a

    w1 = params["w1"].astype(jnp.bfloat16)
    p1 = jnp.concatenate(
        [params["b1"], params["g1"], params["be1"]], axis=0).astype(jnp.float32)
    w2 = pad2(params["w2"]).astype(jnp.bfloat16)
    p2 = jnp.concatenate(
        [pad2(params["b2"]), pad2(params["g2"]), pad2(params["be2"])],
        axis=0).astype(jnp.float32)

    # ---- batch tiling: multiple-of-8 tile; pad B so tb need not divide it ----
    tb_eff = max(8, min(int(tb), ((B + 7) // 8) * 8))
    tb_eff = (tb_eff // 8) * 8
    n_blocks = pl.cdiv(B, tb_eff)
    B_pad = n_blocks * tb_eff
    xp = jnp.pad(x, ((0, B_pad - B), (0, 0))) if B_pad != B else x

    full = lambda shape: pl.BlockSpec(shape, lambda i: (0, 0))
    kernel = functools.partial(transform_embedding_kernel, after_len=after_len)

    out = pl.pallas_call(
        kernel,
        out_shape=jax.ShapeDtypeStruct((B_pad, after_pad), out_dtype),
        grid_spec=pltpu.PrefetchScalarGridSpec(
            num_scalar_prefetch=0,
            grid=(n_blocks,),
            in_specs=[
                pl.BlockSpec((tb_eff, source_len), lambda i: (i, 0)),  # x tile
                full((source_len, HIDDEN)),                            # w1 (bf16)
                full((3, HIDDEN)),                                     # [b1, g1, be1]
                full((HIDDEN, after_pad)),                             # w2 (bf16, padded)
                full((3, after_pad)),                                  # [b2, g2, be2]
            ],
            out_specs=pl.BlockSpec((tb_eff, after_pad), lambda i: (i, 0)),
        ),
        compiler_params=pltpu.CompilerParams(
            dimension_semantics=("parallel",),
            vmem_limit_bytes=48 * 1024 * 1024,
        ),
    )(xp, w1, p1, w2, p2)

    return out[:B, :after_len]


def init_params(key, source_len, after_len):
    """Deterministic synthetic parameters matching nn.Linear / nn.LayerNorm shapes."""
    k1, k2, k3, k4 = jax.random.split(key, 4)
    lim1 = 1.0 / jnp.sqrt(source_len)
    lim2 = 1.0 / jnp.sqrt(HIDDEN)
    return {
        # Linear weights stored transposed (in, out) relative to torch's (out, in)
        "w1": jax.random.uniform(k1, (source_len, HIDDEN), jnp.float32, -lim1, lim1),
        "b1": jax.random.uniform(k2, (1, HIDDEN), jnp.float32, -lim1, lim1),
        "g1": jnp.ones((1, HIDDEN), jnp.float32),
        "be1": jnp.zeros((1, HIDDEN), jnp.float32),
        "w2": jax.random.uniform(k3, (HIDDEN, after_len), jnp.float32, -lim2, lim2),
        "b2": jax.random.uniform(k4, (1, after_len), jnp.float32, -lim2, lim2),
        "g2": jnp.ones((1, after_len), jnp.float32),
        "be2": jnp.zeros((1, after_len), jnp.float32),
    }


def _reference(x, p):
    """Pure-JAX reference (same bf16-matmul / f32-LN semantics as the kernel)."""
    def ln(h, g, b):
        mu = h.mean(-1, keepdims=True)
        var = ((h - mu) ** 2).mean(-1, keepdims=True)
        return (h - mu) / jnp.sqrt(var + LN_EPS) * g + b
    h = jnp.dot(x.astype(jnp.bfloat16), p["w1"].astype(jnp.bfloat16),
                preferred_element_type=jnp.float32) + p["b1"]
    h = jnp.maximum(ln(h, p["g1"], p["be1"]), 0.0)
    y = jnp.dot(h.astype(jnp.bfloat16), p["w2"].astype(jnp.bfloat16),
                preferred_element_type=jnp.float32) + p["b2"]
    y = jnp.maximum(ln(y, p["g2"], p["be2"]), 0.0)
    return y


if __name__ == "__main__":
    # Small shapes; B deliberately NOT a multiple of the tile to exercise padding,
    # and tb=8 so the grid has several steps (megacore sharding path on v7x).
    B, source_len, after_len = 20, 32, 16
    key = jax.random.PRNGKey(0)
    kx, kp = jax.random.split(key)
    x = jax.random.normal(kx, (B, source_len), jnp.float32)
    params = init_params(kp, source_len, after_len)

    y = transform_embedding(x, params, tb=8)
    y = jax.block_until_ready(y)

    y_ref = _reference(x, params)
    assert y.shape == (B, after_len)
    assert jnp.allclose(y, y_ref, atol=2e-3, rtol=2e-3), "mismatch vs reference"
    print("KERNEL_OK")
</pallas_src>

<mosaic_0001>
module attributes {stable_mosaic.version = 11 : i64} {
  func.func @transform_embedding_kernel(%arg0: i32, %arg1: memref<8x32xf32, #tpu.memory_space<vmem>>, %arg2: memref<32x128xbf16, #tpu.memory_space<vmem>>, %arg3: memref<3x128xf32, #tpu.memory_space<vmem>>, %arg4: memref<128x128xbf16, #tpu.memory_space<vmem>>, %arg5: memref<3x128xf32, #tpu.memory_space<vmem>>, %arg6: memref<8x128xf32, #tpu.memory_space<vmem>>) attributes {dimension_semantics = [#tpu.dimension_semantics<parallel>], iteration_bounds = array<i64: 3>, scalar_prefetch = 0 : i64, scratch_operands = 0 : i64, tpu.core_type = #tpu.core_type<tc>, window_params = [{transform_indices = @transform_0, window_bounds = array<i64: 8, 32>}, {pipeline_mode = #tpu.pipeline_mode<synchronous>, transform_indices = @transform_1, window_bounds = array<i64: 32, 128>}, {pipeline_mode = #tpu.pipeline_mode<synchronous>, transform_indices = @transform_2, window_bounds = array<i64: 3, 128>}, {pipeline_mode = #tpu.pipeline_mode<synchronous>, transform_indices = @transform_3, window_bounds = array<i64: 128, 128>}, {pipeline_mode = #tpu.pipeline_mode<synchronous>, transform_indices = @transform_4, window_bounds = array<i64: 3, 128>}, {transform_indices = @transform_5, window_bounds = array<i64: 8, 128>}]} {
    %c0 = arith.constant 0 : index
    %c0_0 = arith.constant 0 : index
    %0 = vector.load %arg1[%c0, %c0_0] : memref<8x32xf32, #tpu.memory_space<vmem>>, vector<8x32xf32>
    %1 = arith.truncf %0 : vector<8x32xf32> to vector<8x32xbf16>
    %c0_1 = arith.constant 0 : index
    %c0_2 = arith.constant 0 : index
    %2 = vector.load %arg2[%c0_1, %c0_2] : memref<32x128xbf16, #tpu.memory_space<vmem>>, vector<32x128xbf16>
    %cst = arith.constant dense<0.000000e+00> : vector<8x128xf32>
    %3 = tpu.matmul %1, %2, %cst {dimension_numbers = #tpu.dot_dimension_numbers<[1], [0], [0], [1], [0, 0, 1, 1], [], []>} : vector<8x32xbf16>, vector<32x128xbf16>, vector<8x128xf32> -> vector<8x128xf32>
    %c0_3 = arith.constant 0 : index
    %c0_4 = arith.constant 0 : index
    %4 = vector.load %arg3[%c0_3, %c0_4] : memref<3x128xf32, #tpu.memory_space<vmem>>, vector<3x128xf32>
    %5 = vector.extract_strided_slice %4 {offsets = [0, 0], sizes = [1, 128], strides = [1, 1]} : vector<3x128xf32> to vector<1x128xf32>
    %6 = vector.broadcast %5 : vector<1x128xf32> to vector<8x128xf32>
    %7 = arith.addf %3, %6 : vector<8x128xf32>
    %cst_5 = arith.constant dense<0.000000e+00> : vector<8xf32>
    %8 = vector.multi_reduction <add>, %7, %cst_5 [1] : vector<8x128xf32> to vector<8xf32>
    %9 = vector.shape_cast %8 : vector<8xf32> to vector<8x1xf32>
    %cst_6 = arith.constant 7.812500e-03 : f32
    %10 = vector.broadcast %cst_6 : f32 to vector<8x1xf32>
    %11 = arith.mulf %9, %10 : vector<8x1xf32>
    %12 = arith.mulf %7, %7 : vector<8x128xf32>
    %cst_7 = arith.constant dense<0.000000e+00> : vector<8xf32>
    %13 = vector.multi_reduction <add>, %12, %cst_7 [1] : vector<8x128xf32> to vector<8xf32>
    %14 = vector.shape_cast %13 : vector<8xf32> to vector<8x1xf32>
    %cst_8 = arith.constant 7.812500e-03 : f32
    %15 = vector.broadcast %cst_8 : f32 to vector<8x1xf32>
    %16 = arith.mulf %14, %15 : vector<8x1xf32>
    %17 = arith.mulf %11, %11 : vector<8x1xf32>
    %18 = arith.subf %16, %17 : vector<8x1xf32>
    %cst_9 = arith.constant 0.000000e+00 : f32
    %19 = vector.broadcast %cst_9 : f32 to vector<8x1xf32>
    %20 = arith.maximumf %18, %19 : vector<8x1xf32>
    %21 = vector.broadcast %11 : vector<8x1xf32> to vector<8x128xf32>
    %22 = arith.subf %7, %21 : vector<8x128xf32>
    %cst_10 = arith.constant 9.99999974E-6 : f32
    %23 = vector.broadcast %cst_10 : f32 to vector<8x1xf32>
    %24 = arith.addf %20, %23 : vector<8x1xf32>
    %25 = math.rsqrt %24 : vector<8x1xf32>
    %26 = vector.broadcast %25 : vector<8x1xf32> to vector<8x128xf32>
    %27 = arith.mulf %22, %26 : vector<8x128xf32>
    %28 = vector.extract_strided_slice %4 {offsets = [1, 0], sizes = [1, 128], strides = [1, 1]} : vector<3x128xf32> to vector<1x128xf32>
    %29 = vector.broadcast %28 : vector<1x128xf32> to vector<8x128xf32>
    %30 = arith.mulf %27, %29 : vector<8x128xf32>
    %31 = vector.extract_strided_slice %4 {offsets = [2, 0], sizes = [1, 128], strides = [1, 1]} : vector<3x128xf32> to vector<1x128xf32>
    %32 = vector.broadcast %31 : vector<1x128xf32> to vector<8x128xf32>
    %33 = arith.addf %30, %32 : vector<8x128xf32>
    %cst_11 = arith.constant 0.000000e+00 : f32
    %34 = vector.broadcast %cst_11 : f32 to vector<8x128xf32>
    %35 = arith.maximumf %33, %34 : vector<8x128xf32>
    %36 = arith.truncf %35 : vector<8x128xf32> to vector<8x128xbf16>
    %c0_12 = arith.constant 0 : index
    %c0_13 = arith.constant 0 : index
    %37 = vector.load %arg4[%c0_12, %c0_13] : memref<128x128xbf16, #tpu.memory_space<vmem>>, vector<128x128xbf16>
    %cst_14 = arith.constant dense<0.000000e+00> : vector<8x128xf32>
    %38 = tpu.matmul %36, %37, %cst_14 {dimension_numbers = #tpu.dot_dimension_numbers<[1], [0], [0], [1], [0, 0, 1, 1], [], []>} : vector<8x128xbf16>, vector<128x128xbf16>, vector<8x128xf32> -> vector<8x128xf32>
    %c0_15 = arith.constant 0 : index
    %c0_16 = arith.constant 0 : index
    %39 = vector.load %arg5[%c0_15, %c0_16] : memref<3x128xf32, #tpu.memory_space<vmem>>, vector<3x128xf32>
    %40 = vector.extract_strided_slice %39 {offsets = [0, 0], sizes = [1, 128], strides = [1, 1]} : vector<3x128xf32> to vector<1x128xf32>
    %41 = vector.broadcast %40 : vector<1x128xf32> to vector<8x128xf32>
    %42 = arith.addf %38, %41 : vector<8x128xf32>
    %cst_17 = arith.constant dense<0.000000e+00> : vector<8xf32>
    %43 = vector.multi_reduction <add>, %42, %cst_17 [1] : vector<8x128xf32> to vector<8xf32>
    %44 = vector.shape_cast %43 : vector<8xf32> to vector<8x1xf32>
    %cst_18 = arith.constant 6.250000e-02 : f32
    %45 = vector.broadcast %cst_18 : f32 to vector<8x1xf32>
    %46 = arith.mulf %44, %45 : vector<8x1xf32>
    %47 = arith.mulf %42, %42 : vector<8x128xf32>
    %cst_19 = arith.constant dense<0.000000e+00> : vector<8xf32>
    %48 = vector.multi_reduction <add>, %47, %cst_19 [1] : vector<8x128xf32> to vector<8xf32>
    %49 = vector.shape_cast %48 : vector<8xf32> to vector<8x1xf32>
    %cst_20 = arith.constant 6.250000e-02 : f32
    %50 = vector.broadcast %cst_20 : f32 to vector<8x1xf32>
    %51 = arith.mulf %49, %50 : vector<8x1xf32>
    %52 = arith.mulf %46, %46 : vector<8x1xf32>
    %53 = arith.subf %51, %52 : vector<8x1xf32>
    %cst_21 = arith.constant 0.000000e+00 : f32
    %54 = vector.broadcast %cst_21 : f32 to vector<8x1xf32>
    %55 = arith.maximumf %53, %54 : vector<8x1xf32>
    %56 = vector.broadcast %46 : vector<8x1xf32> to vector<8x128xf32>
    %57 = arith.subf %42, %56 : vector<8x128xf32>
    %cst_22 = arith.constant 9.99999974E-6 : f32
    %58 = vector.broadcast %cst_22 : f32 to vector<8x1xf32>
    %59 = arith.addf %55, %58 : vector<8x1xf32>
    %60 = math.rsqrt %59 : vector<8x1xf32>
    %61 = vector.broadcast %60 : vector<8x1xf32> to vector<8x128xf32>
    %62 = arith.mulf %57, %61 : vector<8x128xf32>
    %63 = vector.extract_strided_slice %39 {offsets = [1, 0], sizes = [1, 128], strides = [1, 1]} : vector<3x128xf32> to vector<1x128xf32>
    %64 = vector.broadcast %63 : vector<1x128xf32> to vector<8x128xf32>
    %65 = arith.mulf %62, %64 : vector<8x128xf32>
    %66 = vector.extract_strided_slice %39 {offsets = [2, 0], sizes = [1, 128], strides = [1, 1]} : vector<3x128xf32> to vector<1x128xf32>
    %67 = vector.broadcast %66 : vector<1x128xf32> to vector<8x128xf32>
    %68 = arith.addf %65, %67 : vector<8x128xf32>
    %cst_23 = arith.constant 0.000000e+00 : f32
    %69 = vector.broadcast %cst_23 : f32 to vector<8x128xf32>
    %70 = arith.maximumf %68, %69 : vector<8x128xf32>
    %c0_24 = arith.constant 0 : index
    %c0_25 = arith.constant 0 : index
    %71 = vector.load %arg6[%c0_24, %c0_25] : memref<8x128xf32, #tpu.memory_space<vmem>>, vector<8x128xf32>
    tpu.vector_store %arg6[%c0_24, %c0_25], %70 {strides = array<i32>} : memref<8x128xf32, #tpu.memory_space<vmem>>, vector<8x128xf32>,
    return
  }
  func.func @transform_0(%arg0: i32) -> (i32, i32) {
    %c0_i32 = arith.constant 0 : i32
    %c0_i32_0 = arith.constant 0 : i32
    return %arg0, %c0_i32 : i32, i32
  }
  func.func @transform_1(%arg0: i32) -> (i32, i32) {
    %c0_i32 = arith.constant 0 : i32
    %c0_i32_0 = arith.constant 0 : i32
    %c0_i32_1 = arith.constant 0 : i32
    return %c0_i32, %c0_i32_0 : i32, i32
  }
  func.func @transform_2(%arg0: i32) -> (i32, i32) {
    %c0_i32 = arith.constant 0 : i32
    %c0_i32_0 = arith.constant 0 : i32
    %c0_i32_1 = arith.constant 0 : i32
    return %c0_i32, %c0_i32_0 : i32, i32
  }
  func.func @transform_3(%arg0: i32) -> (i32, i32) {
    %c0_i32 = arith.constant 0 : i32
    %c0_i32_0 = arith.constant 0 : i32
    %c0_i32_1 = arith.constant 0 : i32
    return %c0_i32, %c0_i32_0 : i32, i32
  }
  func.func @transform_4(%arg0: i32) -> (i32, i32) {
    %c0_i32 = arith.constant 0 : i32
    %c0_i32_0 = arith.constant 0 : i32
    %c0_i32_1 = arith.constant 0 : i32
    return %c0_i32, %c0_i32_0 : i32, i32
  }
  func.func @transform_5(%arg0: i32) -> (i32, i32) {
    %c0_i32 = arith.constant 0 : i32
    %c0_i32_0 = arith.constant 0 : i32
    return %arg0, %c0_i32 : i32, i32
  }
}

</mosaic_0001>

<bundles_post_ra>
// kernel: tpu_custom_call.1
= control target key start
LH: loop header
LB: loop body
LE: loop exit
PB: predicated region body
PF: predicated region fallthrough
CT: control target
= control target key end

     0   :  { %10 = vsyncpa [#allocation3], 0  ;;  %s1184_s0 = inlined_call_operand.hbm [shape: f32[24,32], index: 0, kind: input, shape index: {}]   ;;  %s1185_s1 = inlined_call_operand.hbm [shape: bf16[32,128], index: 1, kind: input, shape index: {}]   ;;  %s1186_s2 = inlined_call_operand.vmem [shape: f32[3,128], index: 2, kind: input, shape index: {}]   ;;  %s1187_s3 = inlined_call_operand.hbm [shape: bf16[128,128], index: 3, kind: input, shape index: {}]   ;;  %s1188_s4 = inlined_call_operand.vmem [shape: f32[3,128], index: 4, kind: input, shape index: {}]   ;;  %s1189_s5 = inlined_call_operand.hbm [shape: f32[24,128], index: 5, kind: output, shape index: {}]  }
   0x1   :  { %12 = vsyncpa [#allocation3 + $0x1], 0 }
   0x2   :  { %13 = vsyncpa [#allocation6], 0 }
   0x3   :  { %14 = vsyncpa [#allocation4], 0 }
   0x4   :  { %16 = vsyncpa [#allocation4 + $0x1], 0  ;;  %s949_s18 = smov 0   ;;  %s951_s19 = smov 0  }
   0x5   :  { %s953_s20 = smov 0   ;;  %s955_s21 = smov 0  }
   0x6 LB: > { %s970_s22 = sadd.s32 4294967295, %s909_s21   ;;  %s601_s23 = sadd.s32 4294967294, %s909_s21   ;;  %s909_s21 = sphi %s955_s21, %s1208_s21   ;;  %s905_s20 = sphi %s953_s20, %s1207_s20   ;;  %s901_s19 = sphi %s951_s19, %s1206_s19   ;;  %s897_s18 = sphi %s949_s18, %s1205_s18  }
   0x7   : > { %p42_p0 = scmp.ne.s32.totalorder %s901_s19, %s897_s18  ;;  %p1190_p1 = scmp.eq.s32.totalorder %s970_s22, 0 }
   0x8   : > { %p156_p3 = scmp.eq.s32.totalorder %s601_s23, 2  ;;  %p602_p5 = scmp.ge.s32.totalorder %s909_s21, 1 }
   0x9   : > { %p979_p4 = por %p1190_p1, %p42_p0  ;;  %p163_p7 = scmp.lt.s32.totalorder %s909_s21, 4 }
   0xa   : > { %p984_p6 = por %p156_p3, %p42_p0  ;;  %s911_s27 = smov [#allocation5]  }
   0xb   : > { %s1193_s24 = scalar_select %p979_p4, 1, 0 }
   0xc   : > { %s1194_s25 = scalar_select %p984_p6, 1, 0 }
   0xd   : > { %p989_p8 = pnand %p602_p5, %p163_p7  ;;  %s175_s28 = sshll.u32 %s911_s27, 4  ;;  %s176_s28 = int_to_ptr.vmem [resolvable:$true] %s175_s28 }
   0xe   : > { %s912_s30 = smov [#allocation7]   ;;  %s753_s9 = scalar_lea.hbm %s1185_s1, 256 }
   0xf   : > { %s1195_s26 = scalar_select %p989_p8, 1, 0 }
  0x10   : > { %p680_p9 = pneg %p989_p8  ;;  %s191_s6 = sshll.u32 %s912_s30, 4  ;;  %s1001_s6 = int_to_ptr.vmem [resolvable:$true] %s191_s6 }
  0x11   : > { %p754_p11 = scmp.ne.s32.totalorder %s1185_s1, %s753_s9  ;;  %p760_p3 = scmp.lt.u32.totalorder %s753_s9, %s1185_s1 }
  0x12   : > { %p997_p10 = pnand %p680_p9, %p1190_p1 }
  0x14   : > { %p755_p12 = pneg %p997_p10 }
  0x16   : > { %p756_p13 = pnand %p755_p12, %p754_p11 }
  0x18   : > { %p757_p0 = pneg %p756_p13 }
  0x1a   : > { %p762_p5 = pnand %p760_p3, %p757_p0 }
  0x1c   : > { %765 = shalt.err (!%p762_p5)
}
  0x1d   : > { %s766_s14 = scalar_lea.vmem %s176_s28, 256  ;;  %p774_p2 = scmp.lt.s32.totalorder %s176_s28, %s176_s28 }
  0x1e   : > { %p767_p7 = scmp.ne.s32.totalorder %s176_s28, %s766_s14  ;;  %p775_p6 = scmp.lt.s32.totalorder %s766_s14, %s766_s14 }
  0x20   : > { %p769_p9 = pnand %p767_p7, %p755_p12  ;;  %p776_p4 = por %p775_p6, %p774_p2 }
  0x22   : > { %p770_p1 = pneg %p769_p9 }
  0x24   : > { %p777_p8 = pnand %p776_p4, %p770_p1 }
  0x26   : > { %780 = shalt.err (!%p777_p8)
}
  0x27   : > { %s913_s15 = smov 64   ;;  %s914_s16 = smov 4  }
  0x28   : > { %683 = dma.hbm_to_vmem [thread:$0]  (!%p997_p10), %s1185_s1, 256, %s176_s28, [#allocation6], %s913_s15, %s913_s15, %s914_s16  }
  0x29   : > { %s781_s7 = scalar_lea.hbm %s1187_s3, 1024 }
  0x2a   : > { %p782_p11 = scmp.ne.s32.totalorder %s1187_s3, %s781_s7  ;;  %p788_p4 = scmp.lt.u32.totalorder %s781_s7, %s1187_s3 }
  0x2c   : > { %p784_p1 = pnand %p782_p11, %p755_p12 }
  0x2e   : > { %p785_p2 = pneg %p784_p1 }
  0x30   : > { %p790_p6 = pnand %p788_p4, %p785_p2 }
  0x32   : > { %793 = shalt.err (!%p790_p6)
}
  0x33   : > { %s794_s28 = scalar_lea.vmem %s1001_s6, 1024  ;;  %p802_p3 = scmp.lt.s32.totalorder %s1001_s6, %s1001_s6 }
  0x34   : > { %p795_p8 = scmp.ne.s32.totalorder %s1001_s6, %s794_s28  ;;  %p803_p5 = scmp.lt.s32.totalorder %s794_s28, %s794_s28 }
  0x36   : > { %p797_p13 = pnand %p795_p8, %p755_p12  ;;  %p804_p7 = por %p803_p5, %p802_p3 }
  0x38   : > { %p798_p0 = pneg %p797_p13 }
  0x3a   : > { %p805_p9 = pnand %p804_p7, %p798_p0 }
  0x3c   : > { %808 = shalt.err (!%p805_p9)
}
  0x3d   : > { %686 = dma.hbm_to_vmem [thread:$0]  (!%p997_p10), %s1187_s3, 1024, %s1001_s6, [#allocation6], %s913_s15, %s913_s15, %s914_s16  }
  0x3e   : > { %s1051_s14 = sadd.s32 1, %s909_s21   ;;  %s29_s29 = sadd.s32 1, %s905_s20 }
  0x3f   : > { %s26_s17 = ssub.s32 %s909_s21, %s1051_s14  ;;  %p36_p12 = scmp.ne.s32.totalorder %s905_s20, %s901_s19 }
  0x40   : > { %p27_p11 = scmp.eq.s32.totalorder %s26_s17, 0  ;;  %p37_p1 = scmp.eq.s32.totalorder %s909_s21, 0 }
  0x41   : > { %p1197_p2 = scmp.eq.s32.totalorder %s970_s22, 2  ;;  %p697_p6 = scmp.lt.s32.totalorder %s909_s21, 3 }
  0x42   : > { %s1067_s27 = scalar_select %p27_p11, %s905_s20, %s29_s29  }
  0x43   : > { %p1061_p4 = por %p1197_p2, %p36_p12  ;;  %p38_p8 = por %p37_p1, %p36_p12 }
  0x44   : > { %s208_s30 = sand.u32 1, %s905_s20   ;;  %s607_s6 = sshll.u32 %s909_s21, 7 }
  0x45   : > { %s606_s7 = sshll.u32 %s208_s30, 3  ;;  %s1074_s8 = scalar_lea.hbm %s1184_s0, %s607_s6 }
  0x46   : > { %s212_s9 = scalar_lea.vmem [#allocation2], %s606_s7  ;;  %p1078_p10 = pnand %p697_p6, %p38_p8 }
  0x47   : > { %s219_s10 = sshll.u32 %s212_s9, 4  ;;  %s209_s28 = scalar_lea.sflag [#allocation3], %s208_s30  ;;  %s1076_s10 = int_to_ptr.vmem [resolvable:$true] %s219_s10 }
  0x48   : > { %s809_s12 = scalar_lea.hbm %s1074_s8, 128  ;;  %p811_p0 = pneg %p1078_p10 }
  0x49   : > { %p810_p13 = scmp.ne.s32.totalorder %s1074_s8, %s809_s12  ;;  %s814_s17 = scalar_lea.hbm %s1184_s0, 384 }
  0x4a   : > { %p815_p7 = scmp.lt.u32.totalorder %s1074_s8, %s1184_s0  ;;  %p816_p9 = scmp.lt.u32.totalorder %s814_s17, %s809_s12 }
  0x4b   : > { %p812_p3 = pnand %p811_p0, %p810_p13  ;;  %p818_p11 = scmp.lt.u32.totalorder %s809_s12, %s1074_s8 }
  0x4c   : > { %p817_p12 = por %p816_p9, %p815_p7 }
  0x4d   : > { %p813_p5 = pneg %p812_p3 }
  0x4e   : > { %p819_p1 = por %p818_p11, %p817_p12 }
  0x50   : > { %p820_p2 = pnand %p819_p1, %p813_p5 }
  0x52   : > { %823 = shalt.err (!%p820_p2)
}
  0x53   : > { %s824_s30 = scalar_lea.vmem %s1076_s10, 128  ;;  %s915_s15 = smov [#allocation2]  }
  0x54   : > { %p825_p6 = scmp.ne.s32.totalorder %s1076_s10, %s824_s30  ;;  %s829_s16 = sshll.u32 %s915_s15, 4  ;;  %s830_s16 = int_to_ptr.vmem [resolvable:$false] %s829_s16 }
  0x55   : > { %s831_s9 = scalar_lea.vmem %s830_s16, 256  ;;  %p832_p3 = scmp.lt.s32.totalorder %s1076_s10, %s830_s16 }
  0x56   : > { %p827_p8 = pnand %p825_p6, %p811_p0  ;;  %p833_p7 = scmp.lt.s32.totalorder %s831_s9, %s824_s30 }
  0x58   : > { %p828_p13 = pneg %p827_p8  ;;  %p834_p9 = por %p833_p7, %p832_p3 }
  0x5a   : > { %p835_p12 = pnand %p834_p9, %p828_p13 }
  0x5c   : > { %838 = shalt.err (!%p835_p12)
}
  0x5d   : > { %690 = dma.hbm_to_vmem [thread:$0]  (!%p1078_p10), %s1074_s8, 128, %s1076_s10, %s209_s28  }
  0x5e   : > { %p1200_p5 = scmp.ne.s32.totalorder %s1195_s26, 0 }
  0x5f   : > { %s1110_s12 = sand.u32 (!%p1200_p5), 1, %s901_s19   ;;  %p1201_p0 = scmp.ne.s32.totalorder (!%p1200_p5), %s1193_s24, 0 }
  0x60   : > { %228 = sbr.rel (%p1200_p5) target bundleno = 907 (0x38b), region = 40  ;;  %s609_s13 = sshll.u32 (!%p1200_p5), %s1110_s12, 3 }
  0x61   : > { %s231_s29 = scalar_lea.sflag (!%p1200_p5), [#allocation3], %s1110_s12  ;;  %s234_s17 = scalar_lea.vmem (!%p1200_p5), [#allocation2], %s609_s13 }
  0x67   : > { %884 = dma.done.wait (%p1201_p0), %s231_s29, 128  }
  0x68   : > { %886 = vsyncadd (%p1201_p0), %s231_s29, 4294967168  ;;  %p1202_p10 = scmp.eq.s32.totalorder %s970_s22, 0 }
  0x6a   : > { %888 = dma.done.wait (%p1202_p10), [#allocation6], 1280   ;;  %p1203_p11 = pmov %p1202_p10 }
  0x6b   : > { %v916_v0 = vmov 0.0   ;;  %vm917_vm0 = vmmov 0   ;;  %v739_v1 = vld [vmem:[#allocation5] sm:$0xff]   ;;  %v740_v2 = vld [vmem:[#allocation5 + $0x8] sm:$0xff]   ;;  %v270_v3 = vld [vmem:[%s234_s17] sm:$0xff]  ;;  %vm293_vm1 = vcmask 261120   ;;  %v277_v5 = vlaneseq }
  0x6c   : > { %890 = vsyncadd (%p1203_p11), [#allocation6], 4294966016  ;;  %640 = vmatprep.subr.bf16.mxu0 %v916_v0  ;;  %644 = vmatprep.mubr.msk.bf16.mxu0 %vm917_vm0, %v916_v0  ;;  %v271_v4 = vpack.c.bf16 %v270_v3, %v270_v3  ;;  %v276_v8 = vld [vmem:[%s1186_s2] sm:$0x7]  ;;  %v742_v17 = vld [vmem:[#allocation7 + $0x8] sm:$0xff]   ;;  %s625_s11 = sshll.u32 %s970_s22, 7 }
  0x6d   : > { %648 = vmatprep.subr.bf16.mxu1 %v916_v0  ;;  %664 = vmatprep.mubr.msk.bf16.mxu1 %vm917_vm0, %v916_v0  ;;  %v1124_v6 = vshrl.u32 %v277_v5, 7  ;;  %v741_v16 = vld [vmem:[#allocation7] sm:$0xff]   ;;  %v743_v18 = vld [vmem:[#allocation7 + $0x10] sm:$0xff]   ;;  %v744_v19 = vld [vmem:[#allocation7 + $0x18] sm:$0xff]   ;;  %s268_s28 = scalar_lea.vmem [#allocation8], %s609_s13  ;;  %s1141_s15 = scalar_lea.hbm %s1189_s5, %s625_s11 }
  0x6e   : > { %641 = vmatpush3.bf16.msra.mxu0 %v739_v1  ;;  %649 = vmatpush3.bf16.msra.mxu1 %v741_v16  ;;  %v745_v20 = vld [vmem:[#allocation7 + $0x20] sm:$0xff]   ;;  %v746_v21 = vld [vmem:[#allocation7 + $0x28] sm:$0xff]   ;;  %v747_v22 = vld [vmem:[#allocation7 + $0x30] sm:$0xff]   ;;  %s512_s7 = sshll.u32 %s268_s28, 4  ;;  %s499_s16 = scalar_lea.sflag [#allocation4], %s1110_s12  ;;  %s1143_s7 = int_to_ptr.vmem [resolvable:$true] %s512_s7 }
  0x6f   : > { %642 = vmatprep.subr.bf16.mxu0 %v916_v0  ;;  %v279_v7 = vsub.s32 0, %v1124_v6  ;;  %650 = vmatprep.subr.bf16.mxu1 %v916_v0  ;;  %v748_v23 = vld [vmem:[#allocation7 + $0x38] sm:$0xff]   ;;  %v353_v32 = vsub.s32 1, %v1124_v6  ;;  %v358_v33 = vsub.s32 2, %v1124_v6  ;;  %v379_v43 = vld [vmem:[%s1188_s4] sm:$0x7] }
  0x70   : > { %s839_s9 = scalar_lea.vmem %s1143_s7, 128  ;;  %s918_s22 = smov [#allocation8]  }
  0x71   : > { %v280_v9 = vrot.slane %v276_v8, %v279_v7  ;;  %v354_v34 = vrot.slane %v276_v8, %v353_v32  ;;  %v359_v38 = vrot.slane %v276_v8, %v358_v33  ;;  %v383_v44 = vrot.slane %v379_v43, %v279_v7  ;;  %p840_p1 = scmp.ne.s32.totalorder %s1143_s7, %s839_s9  ;;  %s843_s13 = sshll.u32 %s918_s22, 4  ;;  %s844_s13 = int_to_ptr.vmem [resolvable:$false] %s843_s13 }
  0x72   : > { %643 = vmatpush3.bf16.msra.mxu0 %v740_v2  ;;  %651 = vmatpush3.bf16.msra.mxu1 %v742_v17  ;;  %v489_v59 = vrot.slane %v379_v43, %v353_v32  ;;  %v494_v62 = vrot.slane %v379_v43, %v358_v33  ;;  %s845_s29 = scalar_lea.vmem %s844_s13, 256  ;;  %p846_p8 = scmp.lt.s32.totalorder %s1143_s7, %s844_s13 }
  0x73   : > { %652 = vmatprep.subr.bf16.mxu1 %v916_v0  ;;  %p841_p2 = pnand %p840_p1, %p1061_p4  ;;  %p847_p13 = scmp.lt.s32.totalorder %s845_s29, %s839_s9 }
  0x75   : > { %645 = vmatmul.mubr.msk.bf16.vlgmr.msra.gmra.mrb[0].mxu0 %vm293_vm1, %v271_v4  ;;  %p842_p6 = pneg %p841_p2  ;;  %p848_p3 = por %p847_p13, %p846_p8 }
  0x76   : > { %653 = vmatpush3.bf16.msra.mxu1 %v743_v18 }
  0x77   : > { %654 = vmatprep.subr.bf16.mxu1 %v916_v0  ;;  %p849_p7 = pnand %p848_p3, %p842_p6 }
  0x7a   : > { %655 = vmatpush3.bf16.msra.mxu1 %v744_v19 }
  0x7b   : > { %656 = vmatprep.subr.bf16.mxu1 %v916_v0 }
  0x7e   : > { %657 = vmatpush3.bf16.msra.mxu1 %v745_v20 }
  0x7f   : > { %658 = vmatprep.subr.bf16.mxu1 %v916_v0 }
  0x82   : > { %659 = vmatpush3.bf16.msra.mxu1 %v746_v21 }
  0x83   : > { %660 = vmatprep.subr.bf16.mxu1 %v916_v0 }
  0x86   : > { %661 = vmatpush3.bf16.msra.mxu1 %v747_v22 }
  0x87   : > { %662 = vmatprep.subr.bf16.mxu1 %v916_v0 }
  0x8a   : > { %663 = vmatpush3.bf16.msra.mxu1 %v748_v23 }
 0x148   : > { %v331_v10 = vpop.f32.mrb[0].mxu0 }
 0x149   : > { %v332_v11 = vadd.f32 %v331_v10, %v280_v9  ;;  %v646_v12 = vpop.f32.mrb[1].mxu0 }
 0x14a   : > { %v334_v13 = vpop.f32.mrb[2].mxu0 }
 0x14b   : > { %337 = vadd.xlane.f32.xlu0 %v332_v11  ;;  %v647_v14 = vpop.f32.mrb[3].mxu0  ;;  %v340_v15 = vmul.f32 %v332_v11, %v332_v11 }
 0x14f   : > { %341 = vadd.xlane.f32.xlu0 %v340_v15 }
 0x1d8   : > { %v338_v24 = vpop.xlane.xlu0 %337 }
 0x1d9   : > { %v339_v25 = vmul.f32 0.0078125, %v338_v24 }
 0x1db   : > { %v344_v27 = vmul.f32 %v339_v25, %v339_v25  ;;  %v347_v35 = vsub.f32 %v332_v11, %v339_v25 }
 0x1dc   : > { %v342_v26 = vpop.xlane.xlu0 %341 }
 0x1dd   : > { %v343_v28 = vmul.f32 0.0078125, %v342_v26 }
 0x1df   : > { %v345_v29 = vsub.f32 %v343_v28, %v344_v27 }
 0x1e1   : > { %v346_v30 = vmax.f32 %v345_v29, 0.0 }
 0x1e3   : > { %v348_v31 = vadd.f32 1e-05, %v346_v30 }
 0x1e5   : > { %749 = vrsqrt.f32 %v348_v31 }
 0x1ef   : > { %v750_v36 = vpop.eup %749 }
 0x1f0   : > { %v350_v37 = vmul.f32 %v750_v36, %v347_v35 }
 0x1f2   : > { %v355_v39 = vmul.f32 %v354_v34, %v350_v37 }
 0x1f4   : > { %v360_v40 = vadd.f32 %v359_v38, %v355_v39 }
 0x1f6   : > { %v361_v41 = vmax.f32 %v360_v40, 0.0 }
 0x1f8   : > { %v362_v42 = vpack.c.bf16 %v361_v41, %v361_v41 }
 0x1fa   : > { %665 = vmatmul.mubr.bf16.vlgmr.msra.gmra.mrb[0].mxu1 %v362_v42 }
 0x2cd   : > { %v466_v45 = vpop.f32.mrb[0].mxu1 }
 0x2ce   : > { %v467_v46 = vadd.f32 %v466_v45, %v383_v44  ;;  %v666_v47 = vpop.f32.mrb[1].mxu1 }
 0x2cf   : > { %v469_v48 = vpop.f32.mrb[2].mxu1 }
 0x2d0   : > { %472 = vadd.xlane.f32.xlu1 %v467_v46  ;;  %v667_v49 = vpop.f32.mrb[3].mxu1  ;;  %v475_v50 = vmul.f32 %v467_v46, %v467_v46 }
 0x2d4   : > { %476 = vadd.xlane.f32.xlu1 %v475_v50 }
 0x35d   : > { %v473_v51 = vpop.xlane.xlu1 %472 }
 0x35e   : > { %v474_v52 = vmul.f32 0.0625, %v473_v51 }
 0x360   : > { %v479_v54 = vmul.f32 %v474_v52, %v474_v52  ;;  %v482_v60 = vsub.f32 %v467_v46, %v474_v52 }
 0x361   : > { %v477_v53 = vpop.xlane.xlu1 %476 }
 0x362   : > { %v478_v55 = vmul.f32 0.0625, %v477_v53 }
 0x364   : > { %v480_v56 = vsub.f32 %v478_v55, %v479_v54 }
 0x366   : > { %v481_v57 = vmax.f32 %v480_v56, 0.0 }
 0x368   : > { %v483_v58 = vadd.f32 1e-05, %v481_v57 }
 0x36a   : > { %751 = vrsqrt.f32 %v483_v58 }
 0x374   : > { %v752_v61 = vpop.eup %751 }
 0x375   : > { %v485_v63 = vmul.f32 %v752_v61, %v482_v60 }
 0x377   : > { %v490_v0 = vmul.f32 %v489_v59, %v485_v63 }
 0x379   : > { %v495_v1 = vadd.f32 %v494_v62, %v490_v0 }
 0x37b   : > { %v496_v2 = vmax.f32 %v495_v1, 0.0 }
 0x37d   : > { %497 = vst [vmem:[%s268_s28] sm:$0xff] %v496_v2 }
 0x37e   : > { %852 = shalt.err (!%p849_p7)
}
 0x37f   : > { %s853_s12 = scalar_lea.hbm %s1141_s15, 128  ;;  %s857_s26 = scalar_lea.hbm %s1189_s5, 384 }
 0x380   : > { %p854_p9 = scmp.ne.s32.totalorder %s1141_s15, %s853_s12  ;;  %p858_p0 = scmp.lt.u32.totalorder %s1141_s15, %s1189_s5 }
 0x381   : > { %p859_p10 = scmp.lt.u32.totalorder %s857_s26, %s853_s12  ;;  %p861_p1 = scmp.lt.u32.totalorder %s853_s12, %s1141_s15 }
 0x382   : > { %p855_p12 = pnand %p854_p9, %p1061_p4 }
 0x383   : > { %p860_p11 = por %p859_p10, %p858_p0 }
 0x384   : > { %p856_p5 = pneg %p855_p12 }
 0x385   : > { %p862_p2 = por %p861_p1, %p860_p11 }
 0x387   : > { %p863_p6 = pnand %p862_p2, %p856_p5 }
 0x389   : > { %866 = shalt.err (!%p863_p6)
}
 0x38a   : > { %678 = dma.vmem_to_hbm [thread:$0]  (%p1061_p4), %s1143_s7, 128, %s1141_s15, %s499_s16  }
 0x38b PF: > { %p700_p8 = scmp.ge.s32.totalorder %s909_s21, 2  ;;  %s524_s11 = sand.u32 1, %s897_s18  }
 0x38c   : > { %p1204_p13 = scmp.ne.s32.totalorder %s1194_s25, 0  ;;  %s525_s28 = scalar_lea.sflag [#allocation4], %s524_s11 }
 0x38e   : > { %p692_p3 = pnand %p700_p8, %p1204_p13 }
 0x390   : > { %892 = dma.done.wait (!%p692_p3), %s525_s28, 128  }
 0x391   : > { %894 = vsyncadd (!%p692_p3), %s525_s28, 4294967168  ;;  %p19_p7 = scmp.ge.s32.totalorder %s1051_s14, 5   ;;  %s1205_s18 = smov %s901_s19 }
 0x392   : > { %s1206_s19 = smov %s905_s20  ;;  %s1207_s20 = smov %s1067_s27 }
 0x393   : > { %s1208_s21 = smov %s1051_s14  ;;  %21 = sbr.rel (!%p19_p7) target bundleno = 6 (0x6), region = 93 }
 0x39a   :  { %530 = vsyncpa [#allocation3], 1 }
 0x39b   :  { %532 = vsyncpa [#allocation3 + $0x1], 1 }
 0x39c   :  { %533 = vsyncpa [#allocation6], 1 }
 0x39d   :  { %534 = vsyncpa [#allocation4], 1 }
 0x39e   :  { %536 = vsyncpa [#allocation4 + $0x1], 1 }

</bundles_post_ra>
